<compile_context>
chip_gen: v6e
topology: v6e:2x2x1
jax: 0.10.0
libtpu: 0.0.40
codegen_flags: <defaults>
</compile_context>

<pallas_src>
import functools

import jax
import jax.numpy as jnp
from jax import lax
from jax.experimental import pallas as pl
from jax.experimental.pallas import tpu as pltpu


def _round_up(x, m):
    return (x + m - 1) // m * m


def _pick_tile_m(M, Kpad, Npad, tm_req):
    """Pick the M tile: as large as requested, shrunk to fit a VMEM budget
    that is safe on all generations (v5e 16 MiB default scoped, v6e/v7x 32 MiB
    scoped / v7x 64 MiB physical)."""
    tm = min(_round_up(tm_req, 8), _round_up(M, 8))

    def est(t):
        return (2 * t * Kpad * 2        # double-buffered bf16 patch tiles
                + 2 * Kpad * Npad * 2   # bf16 weights (budget 2 buffers)
                + 2 * 1 * Npad * 4      # f32 bias
                + 2 * t * Npad * 4)     # double-buffered f32 output tiles

    budget = 24 * 1024 * 1024
    while tm > 128 and est(tm) > budget:
        tm = _round_up(tm // 2, 8)
    return tm, est(tm)


def _convrnn_matmul_kernel(p_ref, w_ref, b_ref, o_ref):
    """Fused im2col-conv + bias + tanh as a single MXU matmul per M tile.

    p_ref: (TM, Kpad)    bf16 im2col patches (lane-dense)
    w_ref: (Kpad, Npad)  bf16 zero-padded conv weights (resident tile)
    b_ref: (1, Npad)     f32 zero-padded bias
    o_ref: (TM, Npad)    f32 tanh(conv) output tile (lane-dense)
    """
    acc = jnp.dot(p_ref[...], w_ref[...], preferred_element_type=jnp.float32)
    o_ref[...] = jnp.tanh(acc + b_ref[...]).astype(o_ref.dtype)


def conv_rnn_step_pallas(x_nchw, h_nhwc, weight, bias, *, kernel_size, tm=512):
    """Single ConvRNN cell step.

    x_nchw : (B, Cin, H, W)     float32 (user-facing NCHW, PyTorch layout)
    h_nhwc : (B, H, W, Chid)    float32 (internal NHWC recurrent state)
    weight : (Chid, Cin+Chid, kh, kw)   PyTorch Conv2d OIHW layout
    bias   : (Chid,)
    returns: (B, H, W, Chid)    float32 new hidden state (NHWC)
    """
    kh, kw = kernel_size
    B, Cin, H, W = x_nchw.shape
    Chid = h_nhwc.shape[-1]
    C = Cin + Chid

    # ---- glue (plain JAX, fused under jit): concat, 'same' pad, im2col ----
    # Cast to bf16 BEFORE the kh*kw expansion so the inflated copy is half-width.
    x_nhwc = jnp.transpose(x_nchw, (0, 2, 3, 1)).astype(jnp.bfloat16)
    z = jnp.concatenate([x_nhwc, h_nhwc.astype(jnp.bfloat16)], axis=-1)

    # PyTorch 'same': left = (k-1)//2, extra pad on bottom/right for even k.
    ph_l, ph_r = (kh - 1) // 2, kh - 1 - (kh - 1) // 2
    pw_l, pw_r = (kw - 1) // 2, kw - 1 - (kw - 1) // 2
    z = jnp.pad(z, ((0, 0), (ph_l, ph_r), (pw_l, pw_r), (0, 0)))

    K = kh * kw * C
    Kpad = _round_up(K, 128)          # lane-dense K -> one clean MXU push
    Npad = _round_up(Chid, 128)       # lane-dense output -> unmasked vst
    M = B * H * W                     # batch folded into the matmul M dim

    # im2col patches (tap-major, then channel). The K-padding zeros join the
    # same concatenate so the 9x-sized array is materialized exactly once.
    taps = [z[:, ky:ky + H, kx:kx + W, :]
            for ky in range(kh) for kx in range(kw)]
    if Kpad > K:
        taps.append(jnp.zeros((B, H, W, Kpad - K), jnp.bfloat16))
    patches = jnp.concatenate(taps, axis=-1).reshape(M, Kpad)

    # (out, in, kh, kw) -> (kh, kw, in, out) -> (K, Chid): matches the
    # tap-major channel ordering of the patches above.
    w = jnp.transpose(weight, (2, 3, 1, 0)).reshape(K, Chid).astype(jnp.bfloat16)
    w = jnp.pad(w, ((0, Kpad - K), (0, Npad - Chid)))
    b = jnp.pad(bias.astype(jnp.float32).reshape(1, Chid),
                ((0, 0), (0, Npad - Chid)))

    tm_eff, vmem_est = _pick_tile_m(M, Kpad, Npad, tm)
    grid_m = pl.cdiv(M, tm_eff)       # ragged tail handled by the grid, not HBM pad

    cost = pl.CostEstimate(
        flops=2 * M * Kpad * Npad,
        transcendentals=M * Npad,
        bytes_accessed=(M * Kpad * 2 + Kpad * Npad * 2
                        + Npad * 4 + M * Npad * 4),
    )

    out = pl.pallas_call(
        _convrnn_matmul_kernel,
        out_shape=jax.ShapeDtypeStruct((M, Npad), jnp.float32),
        grid_spec=pltpu.PrefetchScalarGridSpec(
            num_scalar_prefetch=0,
            grid=(grid_m,),
            in_specs=[
                pl.BlockSpec((tm_eff, Kpad), lambda i: (i, 0)),
                pl.BlockSpec((Kpad, Npad), lambda i: (0, 0)),   # resident weight
                pl.BlockSpec((1, Npad), lambda i: (0, 0)),      # resident bias
            ],
            out_specs=pl.BlockSpec((tm_eff, Npad), lambda i: (i, 0)),
        ),
        compiler_params=pltpu.CompilerParams(
            dimension_semantics=("parallel",),
            vmem_limit_bytes=int(min(max(32 << 20, vmem_est + (8 << 20)),
                                     60 << 20)),
        ),
        cost_estimate=cost,
    )(patches, w, b)

    # NHWC f32 new state (sliced back to Chid; with Chid >= 128 the slice is a
    # no-op).  The NCHW user-facing transpose happens at the class boundary.
    return out[:, :Chid].reshape(B, H, W, Chid)


def _conv_rnn_step_reference(x, h, weight, bias, kernel_size):
    """Pure-JAX f32 reference (lax conv), NCHW in / NCHW out."""
    kh, kw = kernel_size
    z = jnp.concatenate([x, h], axis=1)
    pad = (((kh - 1) // 2, kh - 1 - (kh - 1) // 2),
           ((kw - 1) // 2, kw - 1 - (kw - 1) // 2))
    y = lax.conv_general_dilated(z, weight, (1, 1), pad,
                                 dimension_numbers=("NCHW", "OIHW", "NCHW"))
    return jnp.tanh(y + bias.reshape(1, -1, 1, 1))


class ConvRNNCellPallas:
    """Stateful wrapper mirroring BaseConvRNNCell.forward() plumbing.

    User-facing API is NCHW (like the PyTorch module); the recurrent state is
    carried NHWC internally so each step avoids an extra relayout pass.
    """

    def __init__(self, input_channels, hidden_channels, kernel_size, key):
        self.input_channels = input_channels
        self.hidden_channels = hidden_channels
        self.kernel_size = kernel_size
        kh, kw = kernel_size
        fan_in = (input_channels + hidden_channels) * kh * kw
        k_w, k_b = jax.random.split(key)
        bound = 1.0 / jnp.sqrt(fan_in)
        self.weight = jax.random.uniform(
            k_w, (hidden_channels, input_channels + hidden_channels, kh, kw),
            minval=-bound, maxval=bound, dtype=jnp.float32)
        self.bias = jax.random.uniform(
            k_b, (hidden_channels,), minval=-bound, maxval=bound,
            dtype=jnp.float32)
        self._state = None   # NHWC f32
        self._step = jax.jit(functools.partial(conv_rnn_step_pallas,
                                               kernel_size=kernel_size))

    # check_forward_input
    def _check_input(self, x):
        if x.shape[1] != self.input_channels:
            raise RuntimeError("Input has inconsistent input_channels.")

    # check_forward_state (state is NHWC internally)
    def _check_state(self, x, h_nhwc):
        if x.shape[0] != h_nhwc.shape[0]:
            raise RuntimeError("Batch size mismatch.")
        if h_nhwc.shape[-1] != self.hidden_channels:
            raise RuntimeError("hidden_channels mismatch.")
        if x.shape[2] != h_nhwc.shape[1] or x.shape[3] != h_nhwc.shape[2]:
            raise RuntimeError("Spatial size mismatch.")

    # _get_state / _init_new_state / _reduce_batch_size_if_needed
    def _get_state(self, x):
        if self._state is None:
            B, _, H, W = x.shape
            return jnp.zeros((B, H, W, self.hidden_channels), jnp.float32)
        h = self._state
        if x.shape[0] < h.shape[0]:
            return h[: x.shape[0]]
        if x.shape[0] > h.shape[0]:
            raise RuntimeError("Batch size of the input is larger than that "
                               "of the state.")
        return h

    def reset_state(self):
        self._state = None

    # repackage_hidden_state: gradient detach is a no-op in this inference port.

    def __call__(self, x):
        self._check_input(x)
        h = self._get_state(x)
        self._check_state(x, h)
        new_h = self._step(x, h, self.weight, self.bias)
        self._state = new_h                           # result == new state
        return jnp.transpose(new_h, (0, 3, 1, 2))     # NCHW for the user


if __name__ == "__main__":
    key = jax.random.PRNGKey(0)
    k_param, k_x1, k_x2 = jax.random.split(key, 3)

    B, Cin, Chid, H, W = 2, 4, 8, 16, 16
    cell = ConvRNNCellPallas(Cin, Chid, (3, 3), k_param)

    x1 = jax.random.normal(k_x1, (B, Cin, H, W), dtype=jnp.float32)
    x2 = jax.random.normal(k_x2, (B, Cin, H, W), dtype=jnp.float32)

    out1 = cell(x1)              # zero-initialized state
    out2 = cell(x2)              # carries state from step 1
    jax.block_until_ready(out1)
    jax.block_until_ready(out2)

    assert out1.shape == (B, Chid, H, W)
    assert out2.shape == (B, Chid, H, W)
    assert bool(jnp.all(jnp.isfinite(out2)))

    # sanity-check both steps against a pure-JAX f32 conv reference
    # (bf16 matmul operands are an intentional precision change).
    h0 = jnp.zeros((B, Chid, H, W), jnp.float32)
    ref1 = _conv_rnn_step_reference(x1, h0, cell.weight, cell.bias, (3, 3))
    ref2 = _conv_rnn_step_reference(x2, ref1, cell.weight, cell.bias, (3, 3))
    d1 = float(jnp.max(jnp.abs(out1 - ref1)))
    d2 = float(jnp.max(jnp.abs(out2 - ref2)))
    assert d1 < 5e-2, f"step-1 mismatch vs reference: {d1}"
    assert d2 < 1e-1, f"step-2 mismatch vs reference: {d2}"

    print("KERNEL_OK")
</pallas_src>

<mosaic_0001>
module attributes {stable_mosaic.version = 11 : i64} {
  func.func @_convrnn_matmul_kernel(%arg0: i32, %arg1: memref<512x128xbf16, #tpu.memory_space<vmem>>, %arg2: memref<128x128xbf16, #tpu.memory_space<vmem>>, %arg3: memref<1x128xf32, #tpu.memory_space<vmem>>, %arg4: memref<512x128xf32, #tpu.memory_space<vmem>>) attributes {dimension_semantics = [#tpu.dimension_semantics<parallel>], iteration_bounds = array<i64: 1>, scalar_prefetch = 0 : i64, scratch_operands = 0 : i64, tpu.core_type = #tpu.core_type<tc>, window_params = [{transform_indices = @transform_0, window_bounds = array<i64: 512, 128>}, {pipeline_mode = #tpu.pipeline_mode<synchronous>, transform_indices = @transform_1, window_bounds = array<i64: 128, 128>}, {pipeline_mode = #tpu.pipeline_mode<synchronous>, transform_indices = @transform_2, window_bounds = array<i64: 1, 128>}, {transform_indices = @transform_3, window_bounds = array<i64: 512, 128>}]} {
    %c0 = arith.constant 0 : index
    %c0_0 = arith.constant 0 : index
    %0 = vector.load %arg1[%c0, %c0_0] : memref<512x128xbf16, #tpu.memory_space<vmem>>, vector<512x128xbf16>
    %c0_1 = arith.constant 0 : index
    %c0_2 = arith.constant 0 : index
    %1 = vector.load %arg2[%c0_1, %c0_2] : memref<128x128xbf16, #tpu.memory_space<vmem>>, vector<128x128xbf16>
    %cst = arith.constant dense<0.000000e+00> : vector<512x128xf32>
    %2 = tpu.matmul %0, %1, %cst {dimension_numbers = #tpu.dot_dimension_numbers<[1], [0], [0], [1], [0, 0, 1, 1], [], []>} : vector<512x128xbf16>, vector<128x128xbf16>, vector<512x128xf32> -> vector<512x128xf32>
    %c0_3 = arith.constant 0 : index
    %c0_4 = arith.constant 0 : index
    %3 = vector.load %arg3[%c0_3, %c0_4] : memref<1x128xf32, #tpu.memory_space<vmem>>, vector<1x128xf32>
    %4 = vector.broadcast %3 : vector<1x128xf32> to vector<512x128xf32>
    %5 = arith.addf %2, %4 : vector<512x128xf32>
    %6 = math.tanh %5 : vector<512x128xf32>
    %c0_5 = arith.constant 0 : index
    %c0_6 = arith.constant 0 : index
    %7 = vector.load %arg4[%c0_5, %c0_6] : memref<512x128xf32, #tpu.memory_space<vmem>>, vector<512x128xf32>
    tpu.vector_store %arg4[%c0_5, %c0_6], %6 {strides = array<i32>} : memref<512x128xf32, #tpu.memory_space<vmem>>, vector<512x128xf32>,
    return
  }
  func.func @transform_0(%arg0: i32) -> (i32, i32) {
    %c0_i32 = arith.constant 0 : i32
    %c0_i32_0 = arith.constant 0 : i32
    return %arg0, %c0_i32 : i32, i32
  }
  func.func @transform_1(%arg0: i32) -> (i32, i32) {
    %c0_i32 = arith.constant 0 : i32
    %c0_i32_0 = arith.constant 0 : i32
    %c0_i32_1 = arith.constant 0 : i32
    return %c0_i32, %c0_i32_0 : i32, i32
  }
  func.func @transform_2(%arg0: i32) -> (i32, i32) {
    %c0_i32 = arith.constant 0 : i32
    %c0_i32_0 = arith.constant 0 : i32
    %c0_i32_1 = arith.constant 0 : i32
    return %c0_i32, %c0_i32_0 : i32, i32
  }
  func.func @transform_3(%arg0: i32) -> (i32, i32) {
    %c0_i32 = arith.constant 0 : i32
    %c0_i32_0 = arith.constant 0 : i32
    return %arg0, %c0_i32 : i32, i32
  }
}

</mosaic_0001>

<bundles_post_ra>
// kernel: conv_rnn_step_pallas.1
= control target key start
LH: loop header
LB: loop body
LE: loop exit
PB: predicated region body
PF: predicated region fallthrough
CT: control target
= control target key end

     0   :  { %s1509_s1 = inlined_call_operand.vmem [shape: bf16[128,128], index: 1, kind: input, shape index: {}]   ;;  %s1510_s0 = inlined_call_operand.vmem [shape: bf16[512,128], index: 0, kind: input, shape index: {}]   ;;  %s1511_s2 = inlined_call_operand.vmem [shape: f32[1,128], index: 2, kind: input, shape index: {}]   ;;  %s1512_s3 = inlined_call_operand.vmem [shape: f32[512,128], index: 3, kind: output, shape index: {}]  }
   0x1   :  { %v940_v0 = vld [vmem:[%s1509_s1 + $0x38] sm:$0xff]   ;;  %v941_v1 = vld [vmem:[%s1509_s1 + $0x30] sm:$0xff]   ;;  %v942_v2 = vld [vmem:[%s1509_s1 + $0x28] sm:$0xff]  }
   0x2   :  { %844 = vmatprep.subr.bf16.mxu0 %v940_v0  ;;  %924 = vmatprep.subr.bf16.mxu1 %v940_v0  ;;  %v943_v3 = vld [vmem:[%s1509_s1 + $0x20] sm:$0xff]   ;;  %v944_v6 = vld [vmem:[%s1509_s1 + $0x18] sm:$0xff]   ;;  %v945_v7 = vld [vmem:[%s1509_s1 + $0x10] sm:$0xff]  }
   0x3   :  { %845 = vmatpush3.bf16.msra.mxu0 %v940_v0  ;;  %932 = vmatpush3.bf16.msra.mxu1 %v940_v0  ;;  %v948_v4 = vld [vmem:[%s1510_s0] sm:$0xff]   ;;  %v946_v8 = vld [vmem:[%s1509_s1 + $0x8] sm:$0xff]   ;;  %v952_v12 = vld [vmem:[%s1510_s0 + $0x10] sm:$0xff]  }
   0x4   :  { %846 = vmatprep.subr.bf16.mxu0 %v941_v1  ;;  %925 = vmatprep.subr.bf16.mxu1 %v941_v1  ;;  %v949_v5 = vld [vmem:[%s1510_s0 + $0x80] sm:$0xff]   ;;  %v950_v10 = vld [vmem:[%s1510_s0 + $0x8] sm:$0xff]   ;;  %v953_v13 = vld [vmem:[%s1510_s0 + $0x90] sm:$0xff]  }
   0x5   :  { %860 = vmatprep.mubr.bf16.mxu0 %v948_v4  ;;  %892 = vmatprep.mubr.bf16.mxu1 %v949_v5  ;;  %v947_v9 = vld [vmem:[%s1509_s1] sm:$0xff]   ;;  %v951_v11 = vld [vmem:[%s1510_s0 + $0x88] sm:$0xff]   ;;  %v954_v14 = vld [vmem:[%s1510_s0 + $0x18] sm:$0xff]  }
   0x6   :  { %v955_v15 = vld [vmem:[%s1510_s0 + $0x98] sm:$0xff]   ;;  %v956_v16 = vld [vmem:[%s1510_s0 + $0x20] sm:$0xff]   ;;  %v958_v18 = vld [vmem:[%s1510_s0 + $0x28] sm:$0xff]  }
   0x7   :  { %847 = vmatpush3.bf16.msra.mxu0 %v941_v1  ;;  %933 = vmatpush3.bf16.msra.mxu1 %v941_v1  ;;  %v957_v17 = vld [vmem:[%s1510_s0 + $0xa0] sm:$0xff]   ;;  %v959_v19 = vld [vmem:[%s1510_s0 + $0xa8] sm:$0xff]   ;;  %v960_v20 = vld [vmem:[%s1510_s0 + $0x30] sm:$0xff]  }
   0x8   :  { %848 = vmatprep.subr.bf16.mxu0 %v942_v2  ;;  %926 = vmatprep.subr.bf16.mxu1 %v942_v2  ;;  %v961_v21 = vld [vmem:[%s1510_s0 + $0xb0] sm:$0xff]   ;;  %v962_v22 = vld [vmem:[%s1510_s0 + $0x38] sm:$0xff]   ;;  %v964_v24 = vld [vmem:[%s1510_s0 + $0x40] sm:$0xff]  }
   0x9   :  { %v963_v23 = vld [vmem:[%s1510_s0 + $0xb8] sm:$0xff]   ;;  %v965_v25 = vld [vmem:[%s1510_s0 + $0xc0] sm:$0xff]   ;;  %v966_v26 = vld [vmem:[%s1510_s0 + $0x48] sm:$0xff]  }
   0xa   :  { %v967_v27 = vld [vmem:[%s1510_s0 + $0xc8] sm:$0xff]   ;;  %v968_v28 = vld [vmem:[%s1510_s0 + $0x50] sm:$0xff]   ;;  %v970_v30 = vld [vmem:[%s1510_s0 + $0x58] sm:$0xff]  }
   0xb   :  { %849 = vmatpush3.bf16.msra.mxu0 %v942_v2  ;;  %934 = vmatpush3.bf16.msra.mxu1 %v942_v2  ;;  %v969_v29 = vld [vmem:[%s1510_s0 + $0xd0] sm:$0xff]   ;;  %v971_v31 = vld [vmem:[%s1510_s0 + $0xd8] sm:$0xff]   ;;  %v972_v32 = vld [vmem:[%s1510_s0 + $0x60] sm:$0xff]  }
   0xc   :  { %850 = vmatprep.subr.bf16.mxu0 %v943_v3  ;;  %927 = vmatprep.subr.bf16.mxu1 %v943_v3  ;;  %v973_v33 = vld [vmem:[%s1510_s0 + $0xe0] sm:$0xff]   ;;  %v974_v34 = vld [vmem:[%s1510_s0 + $0x68] sm:$0xff]   ;;  %v976_v36 = vld [vmem:[%s1510_s0 + $0x70] sm:$0xff]  }
   0xd   :  { %v975_v35 = vld [vmem:[%s1510_s0 + $0xe8] sm:$0xff]   ;;  %v977_v37 = vld [vmem:[%s1510_s0 + $0xf0] sm:$0xff]   ;;  %v978_v38 = vld [vmem:[%s1510_s0 + $0x78] sm:$0xff]  }
   0xe   :  { %v979_v39 = vld [vmem:[%s1510_s0 + $0xf8] sm:$0xff]   ;;  %v1251_v40 = vld [vmem:[%s1511_s2] ss:$0 sm:$0xff] }
   0xf   :  { %851 = vmatpush3.bf16.msra.mxu0 %v943_v3  ;;  %935 = vmatpush3.bf16.msra.mxu1 %v943_v3 }
  0x10   :  { %852 = vmatprep.subr.bf16.mxu0 %v944_v6  ;;  %928 = vmatprep.subr.bf16.mxu1 %v944_v6 }
  0x13   :  { %853 = vmatpush3.bf16.msra.mxu0 %v944_v6  ;;  %936 = vmatpush3.bf16.msra.mxu1 %v944_v6 }
  0x14   :  { %854 = vmatprep.subr.bf16.mxu0 %v945_v7  ;;  %929 = vmatprep.subr.bf16.mxu1 %v945_v7 }
  0x17   :  { %855 = vmatpush3.bf16.msra.mxu0 %v945_v7  ;;  %937 = vmatpush3.bf16.msra.mxu1 %v945_v7 }
  0x18   :  { %856 = vmatprep.subr.bf16.mxu0 %v946_v8  ;;  %930 = vmatprep.subr.bf16.mxu1 %v946_v8 }
  0x1b   :  { %857 = vmatpush3.bf16.msra.mxu0 %v946_v8  ;;  %938 = vmatpush3.bf16.msra.mxu1 %v946_v8 }
  0x1c   :  { %858 = vmatprep.subr.bf16.mxu0 %v947_v9  ;;  %931 = vmatprep.subr.bf16.mxu1 %v947_v9 }
  0x1f   :  { %859 = vmatpush3.bf16.msra.mxu0 %v947_v9  ;;  %939 = vmatpush3.bf16.msra.mxu1 %v947_v9 }
  0x22   :  { %861 = vmatmul.mubr.bf16.vlgmr.msra.gmra.mxu0 %v950_v10  ;;  %893 = vmatmul.mubr.bf16.vlgmr.msra.gmra.mxu1 %v951_v11 }
  0x23   :  { %864 = vmatprep.mubr.bf16.mxu0 %v952_v12  ;;  %896 = vmatprep.mubr.bf16.mxu1 %v953_v13 }
  0x2a   :  { %865 = vmatmul.mubr.bf16.gmra.mxu0 %v954_v14  ;;  %897 = vmatmul.mubr.bf16.gmra.mxu1 %v955_v15 }
  0x2b   :  { %868 = vmatprep.mubr.bf16.mxu0 %v956_v16  ;;  %900 = vmatprep.mubr.bf16.mxu1 %v957_v17 }
  0x32   :  { %869 = vmatmul.mubr.bf16.gmra.mxu0 %v958_v18  ;;  %901 = vmatmul.mubr.bf16.gmra.mxu1 %v959_v19 }
  0x33   :  { %872 = vmatprep.mubr.bf16.mxu0 %v960_v20  ;;  %904 = vmatprep.mubr.bf16.mxu1 %v961_v21 }
  0x3a   :  { %873 = vmatmul.mubr.bf16.gmra.mxu0 %v962_v22  ;;  %905 = vmatmul.mubr.bf16.gmra.mxu1 %v963_v23 }
  0x3b   :  { %876 = vmatprep.mubr.bf16.mxu0 %v964_v24  ;;  %908 = vmatprep.mubr.bf16.mxu1 %v965_v25 }
  0x42   :  { %877 = vmatmul.mubr.bf16.gmra.mxu0 %v966_v26  ;;  %909 = vmatmul.mubr.bf16.gmra.mxu1 %v967_v27 }
  0x43   :  { %880 = vmatprep.mubr.bf16.mxu0 %v968_v28  ;;  %912 = vmatprep.mubr.bf16.mxu1 %v969_v29 }
  0x4a   :  { %881 = vmatmul.mubr.bf16.gmra.mxu0 %v970_v30  ;;  %913 = vmatmul.mubr.bf16.gmra.mxu1 %v971_v31 }
  0x4b   :  { %884 = vmatprep.mubr.bf16.mxu0 %v972_v32  ;;  %916 = vmatprep.mubr.bf16.mxu1 %v973_v33 }
  0x52   :  { %885 = vmatmul.mubr.bf16.gmra.mxu0 %v974_v34  ;;  %917 = vmatmul.mubr.bf16.gmra.mxu1 %v975_v35 }
  0x53   :  { %888 = vmatprep.mubr.bf16.mxu0 %v976_v36  ;;  %920 = vmatprep.mubr.bf16.mxu1 %v977_v37 }
  0x5a   :  { %889 = vmatmul.mubr.bf16.gmra.mxu0 %v978_v38  ;;  %921 = vmatmul.mubr.bf16.gmra.mxu1 %v979_v39 }
  0xe2   :  { %v862_v41 = vpop.f32.mrf.mxu0  ;;  %v894_v42 = vpop.f32.mrf.mxu1 }
  0xe3   :  { %v385_v43 = vadd.f32 %v862_v41, %v1251_v40  ;;  %v513_v44 = vadd.f32 %v894_v42, %v1251_v40 }
  0xe4   :  { %v376_v45 = vpop.f32.mrf.mxu0  ;;  %v504_v46 = vpop.f32.mrf.mxu1 }
  0xe5   :  { %980 = vtanh.f32 %v385_v43  ;;  %v377_v47 = vadd.f32 %v1251_v40, %v376_v45  ;;  %v505_v48 = vadd.f32 %v1251_v40, %v504_v46 }
  0xe6   :  { %982 = vtanh.f32 %v513_v44  ;;  %v863_v49 = vpop.f32.mrf.mxu0  ;;  %v895_v50 = vpop.f32.mrf.mxu1 }
  0xe7   :  { %984 = vtanh.f32 %v377_v47  ;;  %v388_v51 = vadd.f32 %v863_v49, %v1251_v40  ;;  %v516_v52 = vadd.f32 %v895_v50, %v1251_v40 }
  0xe8   :  { %986 = vtanh.f32 %v505_v48  ;;  %v379_v53 = vpop.f32.mrf.mxu0  ;;  %v507_v54 = vpop.f32.mrf.mxu1 }
  0xe9   :  { %988 = vtanh.f32 %v388_v51  ;;  %v380_v55 = vadd.f32 %v1251_v40, %v379_v53  ;;  %v508_v56 = vadd.f32 %v1251_v40, %v507_v54 }
  0xea   :  { %990 = vtanh.f32 %v516_v52  ;;  %v866_v57 = vpop.f32.mrf.mxu0  ;;  %v898_v58 = vpop.f32.mrf.mxu1 }
  0xeb   :  { %992 = vtanh.f32 %v380_v55  ;;  %v401_v59 = vadd.f32 %v866_v57, %v1251_v40  ;;  %v529_v60 = vadd.f32 %v898_v58, %v1251_v40 }
  0xec   :  { %994 = vtanh.f32 %v508_v56  ;;  %v392_v61 = vpop.f32.mrf.mxu0  ;;  %v520_v62 = vpop.f32.mrf.mxu1 }
  0xed   :  { %996 = vtanh.f32 %v401_v59  ;;  %v393_v63 = vadd.f32 %v1251_v40, %v392_v61  ;;  %v521_v0 = vadd.f32 %v1251_v40, %v520_v62 }
  0xee   :  { %998 = vtanh.f32 %v529_v60  ;;  %v867_v1 = vpop.f32.mrf.mxu0  ;;  %v899_v2 = vpop.f32.mrf.mxu1 }
  0xef   :  { %1000 = vtanh.f32 %v393_v63  ;;  %v404_v3 = vadd.f32 %v867_v1, %v1251_v40  ;;  %v532_v4 = vadd.f32 %v899_v2, %v1251_v40 }
  0xf0   :  { %1002 = vtanh.f32 %v521_v0  ;;  %v395_v5 = vpop.f32.mrf.mxu0  ;;  %v523_v6 = vpop.f32.mrf.mxu1 }
  0xf1   :  { %1004 = vtanh.f32 %v404_v3  ;;  %v396_v7 = vadd.f32 %v1251_v40, %v395_v5  ;;  %v524_v8 = vadd.f32 %v1251_v40, %v523_v6 }
  0xf2   :  { %v981_v9 = vpop.eup %980  ;;  %1006 = vtanh.f32 %v532_v4  ;;  %v870_v10 = vpop.f32.mrf.mxu0 }
  0xf3   :  { %v902_v11 = vpop.f32.mrf.mxu1  ;;  %v983_v12 = vpop.eup %982  ;;  %697 = vst [vmem:[%s1512_s3 + $0x10] sm:$0xff] %v981_v9  ;;  %1008 = vtanh.f32 %v396_v7  ;;  %v417_v13 = vadd.f32 %v870_v10, %v1251_v40 }
  0xf4   :  { %v545_v14 = vadd.f32 %v902_v11, %v1251_v40  ;;  %v985_v15 = vpop.eup %984  ;;  %729 = vst [vmem:[%s1512_s3 + $0x110] sm:$0xff] %v983_v12  ;;  %1010 = vtanh.f32 %v524_v8  ;;  %v408_v16 = vpop.f32.mrf.mxu0 }
  0xf5   :  { %v536_v17 = vpop.f32.mrf.mxu1  ;;  %v987_v18 = vpop.eup %986  ;;  %695 = vst [vmem:[%s1512_s3] sm:$0xff] %v985_v15  ;;  %1012 = vtanh.f32 %v417_v13  ;;  %v409_v19 = vadd.f32 %v1251_v40, %v408_v16 }
  0xf6   :  { %v537_v20 = vadd.f32 %v1251_v40, %v536_v17  ;;  %v989_v21 = vpop.eup %988  ;;  %727 = vst [vmem:[%s1512_s3 + $0x100] sm:$0xff] %v987_v18  ;;  %1014 = vtanh.f32 %v545_v14  ;;  %v871_v22 = vpop.f32.mrf.mxu0 }
  0xf7   :  { %v903_v23 = vpop.f32.mrf.mxu1  ;;  %v991_v24 = vpop.eup %990  ;;  %698 = vst [vmem:[%s1512_s3 + $0x18] sm:$0xff] %v989_v21  ;;  %1016 = vtanh.f32 %v409_v19  ;;  %v420_v25 = vadd.f32 %v871_v22, %v1251_v40 }
  0xf8   :  { %v548_v26 = vadd.f32 %v903_v23, %v1251_v40  ;;  %v993_v27 = vpop.eup %992  ;;  %730 = vst [vmem:[%s1512_s3 + $0x118] sm:$0xff] %v991_v24  ;;  %1018 = vtanh.f32 %v537_v20  ;;  %v411_v28 = vpop.f32.mrf.mxu0 }
  0xf9   :  { %v539_v29 = vpop.f32.mrf.mxu1  ;;  %v995_v30 = vpop.eup %994  ;;  %696 = vst [vmem:[%s1512_s3 + $0x8] sm:$0xff] %v993_v27  ;;  %1020 = vtanh.f32 %v420_v25  ;;  %v412_v31 = vadd.f32 %v1251_v40, %v411_v28 }
  0xfa   :  { %v540_v32 = vadd.f32 %v1251_v40, %v539_v29  ;;  %v997_v33 = vpop.eup %996  ;;  %728 = vst [vmem:[%s1512_s3 + $0x108] sm:$0xff] %v995_v30  ;;  %1022 = vtanh.f32 %v548_v26  ;;  %v874_v34 = vpop.f32.mrf.mxu0 }
  0xfb   :  { %v906_v35 = vpop.f32.mrf.mxu1  ;;  %v999_v36 = vpop.eup %998  ;;  %701 = vst [vmem:[%s1512_s3 + $0x30] sm:$0xff] %v997_v33  ;;  %1024 = vtanh.f32 %v412_v31  ;;  %v433_v37 = vadd.f32 %v874_v34, %v1251_v40 }
  0xfc   :  { %v561_v38 = vadd.f32 %v906_v35, %v1251_v40  ;;  %v1001_v39 = vpop.eup %1000  ;;  %733 = vst [vmem:[%s1512_s3 + $0x130] sm:$0xff] %v999_v36  ;;  %1026 = vtanh.f32 %v540_v32  ;;  %v424_v41 = vpop.f32.mrf.mxu0 }
  0xfd   :  { %v552_v42 = vpop.f32.mrf.mxu1  ;;  %v1003_v43 = vpop.eup %1002  ;;  %699 = vst [vmem:[%s1512_s3 + $0x20] sm:$0xff] %v1001_v39  ;;  %1028 = vtanh.f32 %v433_v37  ;;  %v425_v44 = vadd.f32 %v1251_v40, %v424_v41 }
  0xfe   :  { %v553_v45 = vadd.f32 %v1251_v40, %v552_v42  ;;  %v1005_v46 = vpop.eup %1004  ;;  %731 = vst [vmem:[%s1512_s3 + $0x120] sm:$0xff] %v1003_v43  ;;  %1030 = vtanh.f32 %v561_v38  ;;  %v875_v47 = vpop.f32.mrf.mxu0 }
  0xff   :  { %v907_v48 = vpop.f32.mrf.mxu1  ;;  %v1007_v49 = vpop.eup %1006  ;;  %702 = vst [vmem:[%s1512_s3 + $0x38] sm:$0xff] %v1005_v46  ;;  %1032 = vtanh.f32 %v425_v44  ;;  %v436_v50 = vadd.f32 %v875_v47, %v1251_v40 }
 0x100   :  { %v564_v51 = vadd.f32 %v907_v48, %v1251_v40  ;;  %v1009_v52 = vpop.eup %1008  ;;  %734 = vst [vmem:[%s1512_s3 + $0x138] sm:$0xff] %v1007_v49  ;;  %1034 = vtanh.f32 %v553_v45  ;;  %v427_v53 = vpop.f32.mrf.mxu0 }
 0x101   :  { %v555_v54 = vpop.f32.mrf.mxu1  ;;  %v1011_v55 = vpop.eup %1010  ;;  %700 = vst [vmem:[%s1512_s3 + $0x28] sm:$0xff] %v1009_v52  ;;  %1036 = vtanh.f32 %v436_v50  ;;  %v428_v56 = vadd.f32 %v1251_v40, %v427_v53 }
 0x102   :  { %v556_v57 = vadd.f32 %v1251_v40, %v555_v54  ;;  %v1013_v58 = vpop.eup %1012  ;;  %732 = vst [vmem:[%s1512_s3 + $0x128] sm:$0xff] %v1011_v55  ;;  %1038 = vtanh.f32 %v564_v51  ;;  %v878_v59 = vpop.f32.mrf.mxu0 }
 0x103   :  { %v910_v60 = vpop.f32.mrf.mxu1  ;;  %v1015_v61 = vpop.eup %1014  ;;  %705 = vst [vmem:[%s1512_s3 + $0x50] sm:$0xff] %v1013_v58  ;;  %1040 = vtanh.f32 %v428_v56  ;;  %v449_v62 = vadd.f32 %v878_v59, %v1251_v40 }
 0x104   :  { %v577_v63 = vadd.f32 %v910_v60, %v1251_v40  ;;  %v1017_v0 = vpop.eup %1016  ;;  %737 = vst [vmem:[%s1512_s3 + $0x150] sm:$0xff] %v1015_v61  ;;  %1042 = vtanh.f32 %v556_v57  ;;  %v440_v1 = vpop.f32.mrf.mxu0 }
 0x105   :  { %v568_v2 = vpop.f32.mrf.mxu1  ;;  %v1019_v3 = vpop.eup %1018  ;;  %703 = vst [vmem:[%s1512_s3 + $0x40] sm:$0xff] %v1017_v0  ;;  %1044 = vtanh.f32 %v449_v62  ;;  %v441_v4 = vadd.f32 %v1251_v40, %v440_v1 }
 0x106   :  { %v569_v5 = vadd.f32 %v1251_v40, %v568_v2  ;;  %v1021_v6 = vpop.eup %1020  ;;  %735 = vst [vmem:[%s1512_s3 + $0x140] sm:$0xff] %v1019_v3  ;;  %1046 = vtanh.f32 %v577_v63  ;;  %v879_v7 = vpop.f32.mrf.mxu0 }
 0x107   :  { %v911_v8 = vpop.f32.mrf.mxu1  ;;  %v1023_v9 = vpop.eup %1022  ;;  %706 = vst [vmem:[%s1512_s3 + $0x58] sm:$0xff] %v1021_v6  ;;  %1048 = vtanh.f32 %v441_v4  ;;  %v452_v10 = vadd.f32 %v879_v7, %v1251_v40 }
 0x108   :  { %v580_v11 = vadd.f32 %v911_v8, %v1251_v40  ;;  %v1025_v12 = vpop.eup %1024  ;;  %738 = vst [vmem:[%s1512_s3 + $0x158] sm:$0xff] %v1023_v9  ;;  %1050 = vtanh.f32 %v569_v5  ;;  %v443_v13 = vpop.f32.mrf.mxu0 }
 0x109   :  { %v571_v14 = vpop.f32.mrf.mxu1  ;;  %v1027_v15 = vpop.eup %1026  ;;  %704 = vst [vmem:[%s1512_s3 + $0x48] sm:$0xff] %v1025_v12  ;;  %1052 = vtanh.f32 %v452_v10  ;;  %v444_v16 = vadd.f32 %v1251_v40, %v443_v13 }
 0x10a   :  { %v572_v17 = vadd.f32 %v1251_v40, %v571_v14  ;;  %v1029_v18 = vpop.eup %1028  ;;  %736 = vst [vmem:[%s1512_s3 + $0x148] sm:$0xff] %v1027_v15  ;;  %1054 = vtanh.f32 %v580_v11  ;;  %v882_v19 = vpop.f32.mrf.mxu0 }
 0x10b   :  { %v914_v20 = vpop.f32.mrf.mxu1  ;;  %v1031_v21 = vpop.eup %1030  ;;  %709 = vst [vmem:[%s1512_s3 + $0x70] sm:$0xff] %v1029_v18  ;;  %1056 = vtanh.f32 %v444_v16  ;;  %v465_v22 = vadd.f32 %v882_v19, %v1251_v40 }
 0x10c   :  { %v593_v23 = vadd.f32 %v914_v20, %v1251_v40  ;;  %v1033_v24 = vpop.eup %1032  ;;  %741 = vst [vmem:[%s1512_s3 + $0x170] sm:$0xff] %v1031_v21  ;;  %1058 = vtanh.f32 %v572_v17  ;;  %v456_v25 = vpop.f32.mrf.mxu0 }
 0x10d   :  { %v584_v26 = vpop.f32.mrf.mxu1  ;;  %v1035_v27 = vpop.eup %1034  ;;  %707 = vst [vmem:[%s1512_s3 + $0x60] sm:$0xff] %v1033_v24  ;;  %1060 = vtanh.f32 %v465_v22  ;;  %v457_v28 = vadd.f32 %v1251_v40, %v456_v25 }
 0x10e   :  { %v585_v29 = vadd.f32 %v1251_v40, %v584_v26  ;;  %v1037_v30 = vpop.eup %1036  ;;  %739 = vst [vmem:[%s1512_s3 + $0x160] sm:$0xff] %v1035_v27  ;;  %1062 = vtanh.f32 %v593_v23  ;;  %v883_v31 = vpop.f32.mrf.mxu0 }
 0x10f   :  { %v915_v32 = vpop.f32.mrf.mxu1  ;;  %v1039_v33 = vpop.eup %1038  ;;  %710 = vst [vmem:[%s1512_s3 + $0x78] sm:$0xff] %v1037_v30  ;;  %1064 = vtanh.f32 %v457_v28  ;;  %v468_v34 = vadd.f32 %v883_v31, %v1251_v40 }
 0x110   :  { %v596_v35 = vadd.f32 %v915_v32, %v1251_v40  ;;  %v1041_v36 = vpop.eup %1040  ;;  %742 = vst [vmem:[%s1512_s3 + $0x178] sm:$0xff] %v1039_v33  ;;  %1066 = vtanh.f32 %v585_v29  ;;  %v459_v37 = vpop.f32.mrf.mxu0 }
 0x111   :  { %v587_v38 = vpop.f32.mrf.mxu1  ;;  %v1043_v39 = vpop.eup %1042  ;;  %708 = vst [vmem:[%s1512_s3 + $0x68] sm:$0xff] %v1041_v36  ;;  %1068 = vtanh.f32 %v468_v34  ;;  %v460_v41 = vadd.f32 %v1251_v40, %v459_v37 }
 0x112   :  { %v588_v42 = vadd.f32 %v1251_v40, %v587_v38  ;;  %v1045_v43 = vpop.eup %1044  ;;  %740 = vst [vmem:[%s1512_s3 + $0x168] sm:$0xff] %v1043_v39  ;;  %1070 = vtanh.f32 %v596_v35  ;;  %v886_v44 = vpop.f32.mrf.mxu0 }
 0x113   :  { %v918_v45 = vpop.f32.mrf.mxu1  ;;  %v1047_v46 = vpop.eup %1046  ;;  %713 = vst [vmem:[%s1512_s3 + $0x90] sm:$0xff] %v1045_v43  ;;  %1072 = vtanh.f32 %v460_v41  ;;  %v481_v47 = vadd.f32 %v886_v44, %v1251_v40 }
 0x114   :  { %v609_v48 = vadd.f32 %v918_v45, %v1251_v40  ;;  %v1049_v49 = vpop.eup %1048  ;;  %745 = vst [vmem:[%s1512_s3 + $0x190] sm:$0xff] %v1047_v46  ;;  %1074 = vtanh.f32 %v588_v42  ;;  %v472_v50 = vpop.f32.mrf.mxu0 }
 0x115   :  { %v600_v51 = vpop.f32.mrf.mxu1  ;;  %v1051_v52 = vpop.eup %1050  ;;  %711 = vst [vmem:[%s1512_s3 + $0x80] sm:$0xff] %v1049_v49  ;;  %1076 = vtanh.f32 %v481_v47  ;;  %v473_v53 = vadd.f32 %v1251_v40, %v472_v50 }
 0x116   :  { %v601_v54 = vadd.f32 %v1251_v40, %v600_v51  ;;  %v1053_v55 = vpop.eup %1052  ;;  %743 = vst [vmem:[%s1512_s3 + $0x180] sm:$0xff] %v1051_v52  ;;  %1078 = vtanh.f32 %v609_v48  ;;  %v887_v56 = vpop.f32.mrf.mxu0 }
 0x117   :  { %v919_v57 = vpop.f32.mrf.mxu1  ;;  %v1055_v58 = vpop.eup %1054  ;;  %714 = vst [vmem:[%s1512_s3 + $0x98] sm:$0xff] %v1053_v55  ;;  %1080 = vtanh.f32 %v473_v53  ;;  %v484_v59 = vadd.f32 %v887_v56, %v1251_v40 }
 0x118   :  { %v612_v60 = vadd.f32 %v919_v57, %v1251_v40  ;;  %v1057_v61 = vpop.eup %1056  ;;  %746 = vst [vmem:[%s1512_s3 + $0x198] sm:$0xff] %v1055_v58  ;;  %1082 = vtanh.f32 %v601_v54  ;;  %v475_v62 = vpop.f32.mrf.mxu0 }
 0x119   :  { %v603_v63 = vpop.f32.mrf.mxu1  ;;  %v1059_v0 = vpop.eup %1058  ;;  %712 = vst [vmem:[%s1512_s3 + $0x88] sm:$0xff] %v1057_v61  ;;  %1084 = vtanh.f32 %v484_v59  ;;  %v476_v1 = vadd.f32 %v1251_v40, %v475_v62 }
 0x11a   :  { %v604_v2 = vadd.f32 %v1251_v40, %v603_v63  ;;  %v1061_v3 = vpop.eup %1060  ;;  %744 = vst [vmem:[%s1512_s3 + $0x188] sm:$0xff] %v1059_v0  ;;  %1086 = vtanh.f32 %v612_v60  ;;  %v890_v4 = vpop.f32.mrf.mxu0 }
 0x11b   :  { %v922_v5 = vpop.f32.mrf.mxu1  ;;  %v1063_v6 = vpop.eup %1062  ;;  %717 = vst [vmem:[%s1512_s3 + $0xb0] sm:$0xff] %v1061_v3  ;;  %1088 = vtanh.f32 %v476_v1  ;;  %v497_v7 = vadd.f32 %v890_v4, %v1251_v40 }
 0x11c   :  { %v625_v8 = vadd.f32 %v922_v5, %v1251_v40  ;;  %v1065_v9 = vpop.eup %1064  ;;  %749 = vst [vmem:[%s1512_s3 + $0x1b0] sm:$0xff] %v1063_v6  ;;  %1090 = vtanh.f32 %v604_v2  ;;  %v488_v10 = vpop.f32.mrf.mxu0 }
 0x11d   :  { %v616_v11 = vpop.f32.mrf.mxu1  ;;  %v1067_v12 = vpop.eup %1066  ;;  %715 = vst [vmem:[%s1512_s3 + $0xa0] sm:$0xff] %v1065_v9  ;;  %1092 = vtanh.f32 %v497_v7  ;;  %v489_v13 = vadd.f32 %v1251_v40, %v488_v10 }
 0x11e   :  { %v617_v14 = vadd.f32 %v1251_v40, %v616_v11  ;;  %v1069_v15 = vpop.eup %1068  ;;  %747 = vst [vmem:[%s1512_s3 + $0x1a0] sm:$0xff] %v1067_v12  ;;  %1094 = vtanh.f32 %v625_v8  ;;  %v891_v16 = vpop.f32.mrf.mxu0 }
 0x11f   :  { %v923_v17 = vpop.f32.mrf.mxu1  ;;  %v1071_v18 = vpop.eup %1070  ;;  %718 = vst [vmem:[%s1512_s3 + $0xb8] sm:$0xff] %v1069_v15  ;;  %1096 = vtanh.f32 %v489_v13  ;;  %v500_v19 = vadd.f32 %v891_v16, %v1251_v40 }
 0x120   :  { %v628_v20 = vadd.f32 %v923_v17, %v1251_v40  ;;  %v1073_v21 = vpop.eup %1072  ;;  %750 = vst [vmem:[%s1512_s3 + $0x1b8] sm:$0xff] %v1071_v18  ;;  %1098 = vtanh.f32 %v617_v14  ;;  %v491_v22 = vpop.f32.mrf.mxu0 }
 0x121   :  { %v619_v23 = vpop.f32.mrf.mxu1  ;;  %v1075_v24 = vpop.eup %1074  ;;  %716 = vst [vmem:[%s1512_s3 + $0xa8] sm:$0xff] %v1073_v21  ;;  %1100 = vtanh.f32 %v500_v19  ;;  %v492_v25 = vadd.f32 %v1251_v40, %v491_v22 }
 0x122   :  { %v620_v26 = vadd.f32 %v1251_v40, %v619_v23  ;;  %v1077_v27 = vpop.eup %1076  ;;  %748 = vst [vmem:[%s1512_s3 + $0x1a8] sm:$0xff] %v1075_v24  ;;  %1102 = vtanh.f32 %v628_v20 }
 0x123   :  { %v1079_v28 = vpop.eup %1078  ;;  %721 = vst [vmem:[%s1512_s3 + $0xd0] sm:$0xff] %v1077_v27  ;;  %1104 = vtanh.f32 %v492_v25 }
 0x124   :  { %v1081_v29 = vpop.eup %1080  ;;  %753 = vst [vmem:[%s1512_s3 + $0x1d0] sm:$0xff] %v1079_v28  ;;  %1106 = vtanh.f32 %v620_v26 }
 0x125   :  { %v1083_v30 = vpop.eup %1082  ;;  %719 = vst [vmem:[%s1512_s3 + $0xc0] sm:$0xff] %v1081_v29 }
 0x126   :  { %v1085_v40 = vpop.eup %1084  ;;  %751 = vst [vmem:[%s1512_s3 + $0x1c0] sm:$0xff] %v1083_v30 }
 0x127   :  { %v1087_v31 = vpop.eup %1086  ;;  %722 = vst [vmem:[%s1512_s3 + $0xd8] sm:$0xff] %v1085_v40 }
 0x128   :  { %v1089_v32 = vpop.eup %1088  ;;  %754 = vst [vmem:[%s1512_s3 + $0x1d8] sm:$0xff] %v1087_v31 }
 0x129   :  { %v1091_v33 = vpop.eup %1090  ;;  %720 = vst [vmem:[%s1512_s3 + $0xc8] sm:$0xff] %v1089_v32 }
 0x12a   :  { %v1093_v34 = vpop.eup %1092  ;;  %752 = vst [vmem:[%s1512_s3 + $0x1c8] sm:$0xff] %v1091_v33 }
 0x12b   :  { %v1095_v35 = vpop.eup %1094  ;;  %725 = vst [vmem:[%s1512_s3 + $0xf0] sm:$0xff] %v1093_v34 }
 0x12c   :  { %v1097_v36 = vpop.eup %1096  ;;  %757 = vst [vmem:[%s1512_s3 + $0x1f0] sm:$0xff] %v1095_v35 }
 0x12d   :  { %v1099_v37 = vpop.eup %1098  ;;  %723 = vst [vmem:[%s1512_s3 + $0xe0] sm:$0xff] %v1097_v36 }
 0x12e   :  { %v1101_v38 = vpop.eup %1100  ;;  %755 = vst [vmem:[%s1512_s3 + $0x1e0] sm:$0xff] %v1099_v37 }
 0x12f   :  { %v1103_v39 = vpop.eup %1102  ;;  %726 = vst [vmem:[%s1512_s3 + $0xf8] sm:$0xff] %v1101_v38 }
 0x130   :  { %v1105_v41 = vpop.eup %1104  ;;  %758 = vst [vmem:[%s1512_s3 + $0x1f8] sm:$0xff] %v1103_v39 }
 0x131   :  { %v1107_v42 = vpop.eup %1106  ;;  %724 = vst [vmem:[%s1512_s3 + $0xe8] sm:$0xff] %v1105_v41 }
 0x132   :  { %756 = vst [vmem:[%s1512_s3 + $0x1e8] sm:$0xff] %v1107_v42 }

</bundles_post_ra>
